<compile_context>
chip_gen: v7x
topology: tpu7x:2x2x1
jax: 0.10.0
libtpu: 0.0.40
codegen_flags: <defaults>
</compile_context>

<pallas_src>
import jax
import jax.numpy as jnp
from jax.experimental import pallas as pl
from jax.experimental.pallas import tpu as pltpu

_SUBLANE = 8


def _round_up(n, m):
    return ((n + m - 1) // m) * m


def tower_kernel(x_ref, w1_ref, b1_ref, w2_ref, b2_ref, o_ref):
    # fc1: (TB, I) @ (I, H) -> f32 accum, + bias, ReLU (all f32).
    h = jnp.dot(x_ref[...], w1_ref[...], preferred_element_type=jnp.float32)
    h = jnp.maximum(h + b1_ref[...], 0.0)
    # TODO(synk): Dropout(p=0.4) is identity in eval mode; training-mode
    # masking would need pltpu.prng_seed / pltpu.prng_random_bits + 1/(1-p).
    # fc2: (TB, H) @ (H, O) -> f32, + bias, sigmoid (EUP path).
    out = jnp.dot(h, w2_ref[...], preferred_element_type=jnp.float32)
    out = out + b2_ref[...]
    o_ref[...] = jax.nn.sigmoid(out).astype(o_ref.dtype)


def tower_forward(x, w1, b1, w2, b2, *, tb=1024):
    """x: (B, I); w1: (I, H); b1: (1, H); w2: (H, O); b2: (1, O) -> (B, O) f32.

    Weights are stored pre-transposed as (in_features, out_features), so the
    kernel computes x @ W + b (equivalent to PyTorch's x @ W.T + b).
    """
    B, I = x.shape
    Iw, H = w1.shape
    Hw, O = w2.shape
    assert Iw == I and Hw == H and b1.shape == (1, H) and b2.shape == (1, O)

    # Batch tile: large (amortizes the ~0.35us per-grid-step overhead on a
    # mem-bound kernel), sublane-aligned, and split into >=2 grid steps when
    # the batch is big enough so v7x's two TensorCores both get work.
    TB = min(tb, _round_up(B, _SUBLANE))
    if B <= TB and B > 2 * _SUBLANE:
        TB = _round_up(pl.cdiv(B, 2), _SUBLANE)
    grid = (pl.cdiv(B, TB),)

    return pl.pallas_call(
        tower_kernel,
        out_shape=jax.ShapeDtypeStruct((B, O), jnp.float32),
        grid_spec=pl.GridSpec(
            grid=grid,
            in_specs=[
                # x tile streams (unpadded, no wrapper copy).
                pl.BlockSpec((TB, I), lambda i: (i, 0)),
                # Weights/biases: constant block index -> VMEM-resident across
                # the grid.  (pl.Buffered(1) would drop the dead 2nd buffer,
                # but at a few KiB each the default buffering is harmless.)
                pl.BlockSpec((I, H), lambda i: (0, 0)),
                pl.BlockSpec((1, H), lambda i: (0, 0)),
                pl.BlockSpec((H, O), lambda i: (0, 0)),
                pl.BlockSpec((1, O), lambda i: (0, 0)),
            ],
            # True-width output: masked stores, but ~16x less HBM writeback
            # than padding O up to 128 lanes, and no post-call slice.
            out_specs=pl.BlockSpec((TB, O), lambda i: (i, 0)),
        ),
        compiler_params=pltpu.CompilerParams(
            dimension_semantics=("parallel",)),
    )(x, w1, b1, w2, b2)


def _reference(x, w1, b1, w2, b2):
    # Pure-JAX f32 reference (same semantics as PyTorch eval forward).
    return jax.nn.sigmoid(jnp.maximum(x @ w1 + b1, 0.0) @ w2 + b2)


if __name__ == "__main__":
    # Small shapes implied by the module: batch=8, input=32, hidden=32, output=8.
    B, INPUT, HIDDEN, OUTPUT = 8, 32, 32, 8

    key = jax.random.PRNGKey(0)
    kx, kw1, kb1, kw2, kb2, kx2 = jax.random.split(key, 6)

    x = jax.random.normal(kx, (B, INPUT), dtype=jnp.float32)
    # Deterministic parameter init (PyTorch nn.Linear-like uniform scale).
    lim1 = 1.0 / (INPUT ** 0.5)
    lim2 = 1.0 / (HIDDEN ** 0.5)
    w1 = jax.random.uniform(kw1, (INPUT, HIDDEN), jnp.float32, -lim1, lim1)
    b1 = jax.random.uniform(kb1, (1, HIDDEN), jnp.float32, -lim1, lim1)
    w2 = jax.random.uniform(kw2, (HIDDEN, OUTPUT), jnp.float32, -lim2, lim2)
    b2 = jax.random.uniform(kb2, (1, OUTPUT), jnp.float32, -lim2, lim2)

    # Small-batch run (single grid step).
    out = tower_forward(x, w1, b1, w2, b2)
    jax.block_until_ready(out)
    ref = _reference(x, w1, b1, w2, b2)
    assert out.shape == (B, OUTPUT)
    assert jnp.allclose(out, ref, atol=1e-2, rtol=1e-2), (
        float(jnp.max(jnp.abs(out - ref))))

    # Larger, non-aligned batch: exercises >=2 grid steps and the masked
    # partial last tile (no batch padding in the wrapper).
    B2 = 300
    x2 = jax.random.normal(kx2, (B2, INPUT), dtype=jnp.float32)
    out2 = tower_forward(x2, w1, b1, w2, b2)
    jax.block_until_ready(out2)
    ref2 = _reference(x2, w1, b1, w2, b2)
    assert out2.shape == (B2, OUTPUT)
    assert jnp.allclose(out2, ref2, atol=1e-2, rtol=1e-2), (
        float(jnp.max(jnp.abs(out2 - ref2))))

    print("KERNEL_OK")
</pallas_src>

<mosaic_0001>
module attributes {stable_mosaic.version = 11 : i64} {
  func.func @tower_kernel(%arg0: i32, %arg1: memref<8x32xf32, #tpu.memory_space<vmem>>, %arg2: memref<32x32xf32, #tpu.memory_space<vmem>>, %arg3: memref<1x32xf32, #tpu.memory_space<vmem>>, %arg4: memref<32x8xf32, #tpu.memory_space<vmem>>, %arg5: memref<1x8xf32, #tpu.memory_space<vmem>>, %arg6: memref<8x8xf32, #tpu.memory_space<vmem>>) attributes {dimension_semantics = [#tpu.dimension_semantics<parallel>], iteration_bounds = array<i64: 1>, scalar_prefetch = 0 : i64, scratch_operands = 0 : i64, tpu.core_type = #tpu.core_type<tc>, window_params = [{transform_indices = @transform_0, window_bounds = array<i64: 8, 32>}, {pipeline_mode = #tpu.pipeline_mode<synchronous>, transform_indices = @transform_1, window_bounds = array<i64: 32, 32>}, {pipeline_mode = #tpu.pipeline_mode<synchronous>, transform_indices = @transform_2, window_bounds = array<i64: 1, 32>}, {pipeline_mode = #tpu.pipeline_mode<synchronous>, transform_indices = @transform_3, window_bounds = array<i64: 32, 8>}, {pipeline_mode = #tpu.pipeline_mode<synchronous>, transform_indices = @transform_4, window_bounds = array<i64: 1, 8>}, {transform_indices = @transform_5, window_bounds = array<i64: 8, 8>}]} {
    %c0 = arith.constant 0 : index
    %c0_0 = arith.constant 0 : index
    %0 = vector.load %arg1[%c0, %c0_0] : memref<8x32xf32, #tpu.memory_space<vmem>>, vector<8x32xf32>
    %c0_1 = arith.constant 0 : index
    %c0_2 = arith.constant 0 : index
    %1 = vector.load %arg2[%c0_1, %c0_2] : memref<32x32xf32, #tpu.memory_space<vmem>>, vector<32x32xf32>
    %cst = arith.constant dense<0.000000e+00> : vector<8x32xf32>
    %2 = tpu.matmul %0, %1, %cst {dimension_numbers = #tpu.dot_dimension_numbers<[1], [0], [0], [1], [0, 0, 1, 1], [], []>} : vector<8x32xf32>, vector<32x32xf32>, vector<8x32xf32> -> vector<8x32xf32>
    %c0_3 = arith.constant 0 : index
    %c0_4 = arith.constant 0 : index
    %3 = vector.load %arg3[%c0_3, %c0_4] : memref<1x32xf32, #tpu.memory_space<vmem>>, vector<1x32xf32>
    %4 = vector.broadcast %3 : vector<1x32xf32> to vector<8x32xf32>
    %5 = arith.addf %2, %4 : vector<8x32xf32>
    %cst_5 = arith.constant 0.000000e+00 : f32
    %6 = vector.broadcast %cst_5 : f32 to vector<8x32xf32>
    %7 = arith.maximumf %5, %6 : vector<8x32xf32>
    %c0_6 = arith.constant 0 : index
    %c0_7 = arith.constant 0 : index
    %8 = vector.load %arg4[%c0_6, %c0_7] : memref<32x8xf32, #tpu.memory_space<vmem>>, vector<32x8xf32>
    %cst_8 = arith.constant dense<0.000000e+00> : vector<8x8xf32>
    %9 = tpu.matmul %7, %8, %cst_8 {dimension_numbers = #tpu.dot_dimension_numbers<[1], [0], [0], [1], [0, 0, 1, 1], [], []>} : vector<8x32xf32>, vector<32x8xf32>, vector<8x8xf32> -> vector<8x8xf32>
    %c0_9 = arith.constant 0 : index
    %c0_10 = arith.constant 0 : index
    %10 = vector.load %arg5[%c0_9, %c0_10] : memref<1x8xf32, #tpu.memory_space<vmem>>, vector<1x8xf32>
    %11 = vector.broadcast %10 : vector<1x8xf32> to vector<8x8xf32>
    %12 = arith.addf %9, %11 : vector<8x8xf32>
    %13 = arith.negf %12 : vector<8x8xf32>
    %14 = math.exp %13 : vector<8x8xf32>
    %cst_11 = arith.constant 1.000000e+00 : f32
    %15 = vector.broadcast %cst_11 : f32 to vector<8x8xf32>
    %16 = arith.addf %15, %14 : vector<8x8xf32>
    %17 = arith.divf %15, %16 : vector<8x8xf32>
    %c0_12 = arith.constant 0 : index
    %c0_13 = arith.constant 0 : index
    %18 = vector.load %arg6[%c0_12, %c0_13] : memref<8x8xf32, #tpu.memory_space<vmem>>, vector<8x8xf32>
    tpu.vector_store %arg6[%c0_12, %c0_13], %17 {strides = array<i32>} : memref<8x8xf32, #tpu.memory_space<vmem>>, vector<8x8xf32>,
    return
  }
  func.func @transform_0(%arg0: i32) -> (i32, i32) {
    %c0_i32 = arith.constant 0 : i32
    %c0_i32_0 = arith.constant 0 : i32
    return %arg0, %c0_i32 : i32, i32
  }
  func.func @transform_1(%arg0: i32) -> (i32, i32) {
    %c0_i32 = arith.constant 0 : i32
    %c0_i32_0 = arith.constant 0 : i32
    %c0_i32_1 = arith.constant 0 : i32
    return %c0_i32, %c0_i32_0 : i32, i32
  }
  func.func @transform_2(%arg0: i32) -> (i32, i32) {
    %c0_i32 = arith.constant 0 : i32
    %c0_i32_0 = arith.constant 0 : i32
    %c0_i32_1 = arith.constant 0 : i32
    return %c0_i32, %c0_i32_0 : i32, i32
  }
  func.func @transform_3(%arg0: i32) -> (i32, i32) {
    %c0_i32 = arith.constant 0 : i32
    %c0_i32_0 = arith.constant 0 : i32
    %c0_i32_1 = arith.constant 0 : i32
    return %c0_i32, %c0_i32_0 : i32, i32
  }
  func.func @transform_4(%arg0: i32) -> (i32, i32) {
    %c0_i32 = arith.constant 0 : i32
    %c0_i32_0 = arith.constant 0 : i32
    %c0_i32_1 = arith.constant 0 : i32
    return %c0_i32, %c0_i32_0 : i32, i32
  }
  func.func @transform_5(%arg0: i32) -> (i32, i32) {
    %c0_i32 = arith.constant 0 : i32
    %c0_i32_0 = arith.constant 0 : i32
    return %arg0, %c0_i32 : i32, i32
  }
}

</mosaic_0001>

<bundles_post_ra>
// kernel: tpu_custom_call.1
= control target key start
LH: loop header
LB: loop body
LE: loop exit
PB: predicated region body
PF: predicated region fallthrough
CT: control target
= control target key end

     0   :  { %v295_v3 = vmov 0.0|0.0   ;;  %vm296_vm0 = vmmov 0   ;;  %v297_v6 = vmov 0.0   ;;  %s374_s0 = inlined_call_operand.vmem [shape: f32[8,32], index: 0, kind: input, shape index: {}]   ;;  %s375_s1 = inlined_call_operand.vmem [shape: f32[32,32], index: 1, kind: input, shape index: {}]   ;;  %s376_s2 = inlined_call_operand.vmem [shape: f32[1,32], index: 2, kind: input, shape index: {}]   ;;  %s377_s3 = inlined_call_operand.vmem [shape: f32[32,8], index: 3, kind: input, shape index: {}]   ;;  %s378_s4 = inlined_call_operand.vmem [shape: f32[1,8], index: 4, kind: input, shape index: {}]   ;;  %s379_s5 = inlined_call_operand.hbm [shape: f32[8,8], index: 5, kind: output, shape index: {}]  }
   0x1   :  { %v22_v0 = vld [vmem:[%s375_s1] sm:$0xff]  ;;  %v23_v1 = vld [vmem:[%s375_s1 + $0x8] sm:$0xff]  ;;  %v24_v2 = vld [vmem:[%s375_s1 + $0x10] sm:$0xff]  ;;  %251 = vmatprep.subr.bf16.mxu0 %v295_v3  ;;  %237 = vmatprep.mubr.msk.f32.mxu0 %vm296_vm0, %v297_v6 }
   0x2   :  { %v252_v4 = vpack.c.bf16 %v23_v1, %v22_v0  ;;  %v25_v5 = vld [vmem:[%s375_s1 + $0x18] sm:$0xff]  ;;  %v108_v7 = vld [vmem:[%s377_s3] sm:$0xff]  ;;  %257 = vmatprep.subr.bf16.mxu1 %v295_v3  ;;  %v109_v8 = vld [vmem:[%s377_s3 + $0x8] sm:$0xff]  ;;  %248 = vmatprep.mubr.msk.f32.mxu1 %vm296_vm0, %v297_v6 }
   0x3   :  { %10 = vsyncpa [#allocation3], 0  ;;  %v255_v9 = vpack.c.bf16 %v25_v5, %v24_v2  ;;  %v258_v10 = vpack.c.bf16 %v109_v8, %v108_v7  ;;  %v21_v11 = vld [vmem:[%s374_s0] sm:$0xff]  ;;  %vm33_vm1 = vcmask 261120   ;;  %v110_v12 = vld [vmem:[%s377_s3 + $0x10] sm:$0xff]  ;;  %vm198_vm2 = vcmask 64512  }
   0x4   :  { %253 = vmatpush3.bf16.msra.mxu0 %v252_v4  ;;  %v111_v13 = vld [vmem:[%s377_s3 + $0x18] sm:$0xff]  ;;  %v214_v15 = vld [vmem:[%s376_s2] ss:$0 sm:$0xff]  ;;  %s298_s3 = smov [#allocation2]  }
   0x5   :  { %254 = vmatprep.subr.bf16.mxu0 %v295_v3  ;;  %259 = vmatpush3.bf16.msra.mxu1 %v258_v10  ;;  %v261_v14 = vpack.c.bf16 %v111_v13, %v110_v12  ;;  %v216_v20 = vld [vmem:[%s378_s4] ss:$0 sm:$0xff]  ;;  %s206_s13 = sshll.u32 %s298_s3, 4  ;;  %s207_s13 = int_to_ptr.vmem [resolvable:$true] %s206_s13 }
   0x6   :  { %260 = vmatprep.subr.bf16.mxu1 %v295_v3  ;;  %s271_s2 = scalar_lea.vmem %s207_s13, 128  ;;  %p276_p1 = scmp.lt.s32.totalorder %s207_s13, %s207_s13 }
   0x7   :  { %p272_p0 = scmp.ne.s32.totalorder %s207_s13, %s271_s2  ;;  %p277_p2 = scmp.lt.s32.totalorder %s271_s2, %s271_s2 }
   0x8   :  { %256 = vmatpush3.bf16.msra.mxu0 %v255_v9 }
   0x9   :  { %262 = vmatpush3.bf16.msra.mxu1 %v261_v14  ;;  %p278_p3 = por %p277_p2, %p276_p1 }
   0xb   :  { %238 = vmatmul.mubr.msk.f32.vlgmr.msra.gmra.mrb[0].mxu0 %vm33_vm1, %v21_v11  ;;  %p279_p4 = pnand %p278_p3, %p272_p0 }
  0xde   :  { %v103_v16 = vpop.f32.mrb[0].mxu0 }
  0xdf   :  { %v104_v17 = vadd.f32 %v214_v15, %v103_v16  ;;  %v239_v18 = vpop.f32.mrb[1].mxu0 }
  0xe1   :  { %v107_v19 = vmax.f32 %v104_v17, 0.0 }
  0xe3   :  { %249 = vmatmul.mubr.msk.f32.vlgmr.msra.gmra.mrb[0].mxu1 %vm33_vm1, %v107_v19 }
 0x1b6   :  { %v188_v21 = vpop.f32.mrb[0].mxu1 }
 0x1b7   :  { %v189_v22 = vadd.f32 %v216_v20, %v188_v21  ;;  %v250_v23 = vpop.f32.mrb[1].mxu1 }
 0x1b9   :  { %v218_v24 = vmul.f32 -1.442695, %v189_v22 }
 0x1bb   :  { %267 = vpow2.f32 %v218_v24 }
 0x1c5   :  { %v268_v25 = vpop.eup %267 }
 0x1c6   :  { %v195_v26 = vadd.f32 1.0, %v268_v25 }
 0x1c8   :  { %269 = vrcp.f32 %v195_v26 }
 0x1d2   :  { %v270_v27 = vpop.eup %269 }
 0x1d3   :  { %199 = vst.msk [vmem:[#allocation2] sm:$0xff] %vm198_vm2, %v270_v27 }
 0x1d4   :  { %282 = shalt.err (!%p279_p4)
}
 0x1d5   :  { %s283_s15 = scalar_lea.hbm %s379_s5, 128 }
 0x1d6   :  { %p284_p5 = scmp.ne.s32.totalorder %s379_s5, %s283_s15  ;;  %p287_p6 = scmp.lt.u32.totalorder %s283_s15, %s379_s5 }
 0x1d8   :  { %p289_p7 = pnand %p287_p6, %p284_p5 }
 0x1da   :  { %292 = shalt.err (!%p289_p7)
}
 0x1db   :  { %209 = dma.vmem_to_hbm [thread:$0]  %s207_s13, 128, %s379_s5, [#allocation3]  }
 0x1dc   :  { %293 = dma.done.wait [#allocation3], 128  }
 0x1dd   :  { %294 = vsyncadd [#allocation3], 4294967168 }
 0x1de   :  { %213 = vsyncpa [#allocation3], 1 }

</bundles_post_ra>
